<compile_context>
chip_gen: v5e
topology: v5e:2x2
jax: 0.10.0
libtpu: 0.0.40
codegen_flags: <defaults>
</compile_context>

<pallas_src>
import jax
import jax.numpy as jnp
from jax.experimental import pallas as pl
from jax.experimental.pallas import tpu as pltpu


def _round_up(a, b):
    return (a + b - 1) // b * b


def _cdiv(a, b):
    return -(-a // b)


# ----------------------------------------------------------------------------
# Pallas kernel: one (NB, channels, TILE_PIXELS) block per grid step.
#   h   = relu(W1g @ g + W1x @ x + b1)        (1x1 conv1 + BN1 folded + ReLU)
#   s   = relu(sum_f(w2_f * h_f) + b2)        (1x1 conv2 + BN2 folded + ReLU)
#   att = sigmoid(cp * s + bn_c)              (bn_a pre-folded into cp)
#   out = x * att
# ----------------------------------------------------------------------------
def msgcs_kernel(scal_ref, g_ref, x_ref, cp_ref,
                 w1g_ref, w1x_ref, b1_ref, w2_ref, out_ref):
    # Block shapes:
    #   g_ref  : (NB, F_g, TM)   x_ref  : (NB, F_l, TM)   cp_ref : (1, TM)
    #   w1g_ref: (F_int, F_g)    w1x_ref: (F_int, F_l)
    #   b1_ref : (F_int, 1)      w2_ref : (F_int, 1)
    #   scal_ref (SMEM f32[2])   = [b2, bn_c]
    w1g = w1g_ref[...]
    w1x = w1x_ref[...]
    b1 = b1_ref[...]
    w2 = w2_ref[...]
    cp = cp_ref[...]
    b2 = scal_ref[0]
    bn_c = scal_ref[1]

    nb = g_ref.shape[0]
    for b in range(nb):                                    # NB is small & static
        x = x_ref[b]                                       # (F_l, TM)
        h = (jnp.dot(w1g, g_ref[b], preferred_element_type=jnp.float32)
             + jnp.dot(w1x, x, preferred_element_type=jnp.float32)
             + b1)
        h = jnp.maximum(h, 0.0)                            # (F_int, TM)
        # conv2 (F_int -> 1): VPU mul + sublane (XLU) reduce.
        s = jnp.sum(h * w2, axis=0, keepdims=True) + b2
        s = jnp.maximum(s, 0.0)                            # (1, TM)
        att = jax.nn.sigmoid(cp * s + bn_c)                # (1, TM)
        out_ref[b] = x * att                               # (F_l, TM)


def msgcs_pallas(scalars, g3, x3, cp, w1g, w1x, b1, w2,
                 *, tile_m, nb, vmem_limit):
    N, F_g, HWp = g3.shape
    _, F_l, _ = x3.shape
    F_int = w1g.shape[0]
    assert HWp % tile_m == 0 and N % nb == 0

    grid = (HWp // tile_m, N // nb)   # pixels outer, batch inner -> cp reused

    return pl.pallas_call(
        msgcs_kernel,
        out_shape=jax.ShapeDtypeStruct((N, F_l, HWp), jnp.float32),
        grid=grid,
        in_specs=[
            pl.BlockSpec(memory_space=pltpu.MemorySpace.SMEM),        # scalars
            pl.BlockSpec((nb, F_g, tile_m), lambda p, n: (n, 0, p)),  # g
            pl.BlockSpec((nb, F_l, tile_m), lambda p, n: (n, 0, p)),  # x
            pl.BlockSpec((1, tile_m), lambda p, n: (0, p)),           # cp
            pl.BlockSpec((F_int, F_g), lambda p, n: (0, 0)),          # W1 (g part)
            pl.BlockSpec((F_int, F_l), lambda p, n: (0, 0)),          # W1 (x part)
            pl.BlockSpec((F_int, 1), lambda p, n: (0, 0)),            # b1
            pl.BlockSpec((F_int, 1), lambda p, n: (0, 0)),            # w2
        ],
        out_specs=pl.BlockSpec((nb, F_l, tile_m), lambda p, n: (n, 0, p)),
        compiler_params=pltpu.CompilerParams(
            dimension_semantics=("parallel", "parallel"),
            vmem_limit_bytes=vmem_limit),
    )(scalars, g3, x3, cp, w1g, w1x, b1, w2)


# ----------------------------------------------------------------------------
# Tile / batch-block selection (generation-aware VMEM budget).
# ----------------------------------------------------------------------------
def _pick_nb(N, tile_m, nb_cap, *, target_px=8192, unroll_cap=8):
    cap = max(1, min(int(nb_cap), unroll_cap, N))
    want = min(cap, max(1, _cdiv(target_px, tile_m)))
    divs = [d for d in range(1, N + 1) if N % d == 0 and d <= cap]
    for d in divs:                      # smallest divisor reaching the target
        if d >= want:
            return d
    return divs[-1]                     # else largest divisor that fits


def _choose_tiling(N, F_g, F_l, F_int, HW, *, tile_m_max=65536):
    try:
        vmem_cap = int(pltpu.get_tpu_info().vmem_capacity_bytes)
    except Exception:
        vmem_cap = 64 << 20             # conservative fallback (v7x per-TC)
    # Per-chip working budget: ~16 MiB on 64 MiB VMEM chips, 24 MiB on 128 MiB.
    budget = min(max(vmem_cap // 4, 8 << 20), 24 << 20)
    slack = 1 << 20                     # weights + compiler scratch headroom

    def su(c):                          # sublane (8) padding of small channel dims
        return _round_up(c, 8)

    # f32 bytes/pixel/image in one step: g(x2 buf) + x(x2) + out(x2) + h temp(x1)
    img_px = (2 * su(F_g) + 4 * su(F_l) + su(F_int)) * 4
    cp_px = 8 * 4 * 2                   # cp row, 8-sublane padded, double-buffered

    HW128 = _round_up(HW, 128)
    tm_cap = max(128, min(tile_m_max,
                          ((budget - slack) // (img_px + cp_px)) // 128 * 128))
    n_tiles = _cdiv(HW128, tm_cap)
    tile_m = _round_up(_cdiv(HW128, n_tiles), 128)   # near-equal aligned tiles
    hw_pad = tile_m * n_tiles                        # waste <= ~128 px per tile

    nb_cap = max(1, (budget - slack - cp_px * tile_m) // (img_px * tile_m))
    nb = _pick_nb(N, tile_m, nb_cap)

    vmem_limit = int(min(vmem_cap // 2, 64 << 20))
    return tile_m, hw_pad, nb, vmem_limit


# ----------------------------------------------------------------------------
# Wrapper: layout plumbing only (reshape NCHW -> (N, C, H*W), minimal padding).
# ----------------------------------------------------------------------------
def msgcs_forward(g, x, params):
    """g: (N, F_g, H, W), x: (N, F_l, H, W) float32 NCHW (PyTorch layout)."""
    N, F_g, H, W = g.shape
    _, F_l, _, _ = x.shape
    F_int = params["w1g"].shape[0]
    HW = H * W

    tile_m, HW_pad, nb, vmem_limit = _choose_tiling(N, F_g, F_l, F_int, HW)

    # NCHW -> (N, C, H*W): free reshape, no transpose, no channel concat.
    g3 = g.reshape(N, F_g, HW)
    x3 = x.reshape(N, F_l, HW)
    # Fold bn_a into cp (att = sigmoid(bn_a*(cp*s)+bn_c) == sigmoid((bn_a*cp)*s+bn_c)).
    cp = (params["bn_a"] * (params["rel_h"] + params["rel_w"])).reshape(1, HW)
    if HW_pad != HW:
        g3 = jnp.pad(g3, ((0, 0), (0, 0), (0, HW_pad - HW)))
        x3 = jnp.pad(x3, ((0, 0), (0, 0), (0, HW_pad - HW)))
        cp = jnp.pad(cp, ((0, 0), (0, HW_pad - HW)))

    scalars = jnp.stack([params["b2"], params["bn_c"]]).astype(jnp.float32)

    out = msgcs_pallas(scalars, g3, x3, cp,
                       params["w1g"], params["w1x"], params["b1"], params["w2"],
                       tile_m=tile_m, nb=nb, vmem_limit=vmem_limit)
    return out[:, :, :HW].reshape(N, F_l, H, W)


# ----------------------------------------------------------------------------
# Parameter construction (deterministic, synthetic) + inference-BN folding.
# ----------------------------------------------------------------------------
def make_params(key, F_g, F_l, F_int, size):
    H, W = size
    ks = jax.random.split(key, 12)
    Cin = F_g + F_l
    eps = 1e-5

    # Conv1 (1x1): Cin -> F_int, as a (Cin, F_int) matmul weight.
    w1 = jax.random.normal(ks[0], (Cin, F_int), jnp.float32) * 0.1
    b1 = jax.random.normal(ks[1], (F_int,), jnp.float32) * 0.1
    # BN1 (inference): fold into conv1.
    g1 = 1.0 + 0.1 * jax.random.normal(ks[2], (F_int,), jnp.float32)
    be1 = 0.1 * jax.random.normal(ks[3], (F_int,), jnp.float32)
    mu1 = 0.1 * jax.random.normal(ks[4], (F_int,), jnp.float32)
    v1 = 1.0 + 0.1 * jax.random.uniform(ks[5], (F_int,), jnp.float32)
    s1 = g1 / jnp.sqrt(v1 + eps)
    w1_f = w1 * s1[None, :]                 # (Cin, F_int)
    b1_f = (b1 - mu1) * s1 + be1            # (F_int,)

    # Conv2 (1x1): F_int -> 1, plus BN2 folded.
    w2 = jax.random.normal(ks[6], (F_int, 1), jnp.float32) * 0.1
    b2 = jax.random.normal(ks[7], (1,), jnp.float32) * 0.1
    g2 = 1.0 + 0.1 * jax.random.normal(ks[8], (1,), jnp.float32)
    be2 = 0.1 * jax.random.normal(ks[9], (1,), jnp.float32)
    mu2 = jnp.zeros((1,), jnp.float32)
    v2 = jnp.ones((1,), jnp.float32)
    s2 = g2 / jnp.sqrt(v2 + eps)
    w2_f = w2 * s2[None, :]                 # (F_int, 1)
    b2_f = (b2 - mu2) * s2 + be2            # (1,)

    # Positional terms.
    rel_h = jax.random.normal(ks[10], (1, 1, H, 1), jnp.float32)
    rel_w = jax.random.normal(ks[11], (1, 1, 1, W), jnp.float32)

    # Final BN (1 channel, inference, default init) folded to scalar affine.
    bn_gamma, bn_beta, bn_mu, bn_var = 1.0, 0.0, 0.0, 1.0
    bn_a = bn_gamma / (bn_var + eps) ** 0.5
    bn_c = bn_beta - bn_mu * bn_a

    # Kernel-friendly layout: W1^T split into g / x parts, column biases.
    w1_t = w1_f.T                           # (F_int, Cin)
    return dict(
        w1g=w1_t[:, :F_g],                  # (F_int, F_g)
        w1x=w1_t[:, F_g:],                  # (F_int, F_l)
        b1=b1_f.reshape(F_int, 1),
        w2=w2_f.reshape(F_int, 1),
        b2=b2_f[0],
        rel_h=rel_h, rel_w=rel_w,
        bn_a=jnp.asarray(bn_a, jnp.float32),
        bn_c=jnp.asarray(bn_c, jnp.float32))


def msgcs_reference(g, x, params):
    """Plain-JAX reference for validation (operates on NCHW directly)."""
    gx = jnp.concatenate([g, x], axis=1)                          # (N, Cin, H, W)
    w1 = jnp.concatenate([params["w1g"], params["w1x"]], axis=1)  # (F_int, Cin)
    h = jnp.einsum('fc,nchw->nfhw', w1, gx) + params["b1"][None, :, :, None]
    h = jnp.maximum(h, 0.0)
    s = jnp.einsum('fo,nfhw->nohw', params["w2"], h) + params["b2"]
    s = jnp.maximum(s, 0.0)                                       # (N, 1, H, W)
    cp = params["rel_h"] + params["rel_w"]                        # (1, 1, H, W)
    att = jax.nn.sigmoid(params["bn_a"] * (cp * s) + params["bn_c"])
    return att * x


if __name__ == "__main__":
    # Small shapes consistent with the module: F_g=4, F_l=4, F_int=8, size=(16,16)
    N, F_g, F_l, F_int, H, W = 2, 4, 4, 8, 16, 16

    key = jax.random.PRNGKey(0)
    kg, kx, kp = jax.random.split(key, 3)
    g = jax.random.normal(kg, (N, F_g, H, W), jnp.float32)
    x = jax.random.normal(kx, (N, F_l, H, W), jnp.float32)
    params = make_params(kp, F_g, F_l, F_int, (H, W))

    out = jax.jit(msgcs_forward)(g, x, params)
    out = jax.block_until_ready(out)

    ref = msgcs_reference(g, x, params)
    assert out.shape == (N, F_l, H, W)
    assert jnp.allclose(out, ref, atol=1e-5, rtol=1e-5), "mismatch vs reference"

    print("KERNEL_OK")
</pallas_src>

<mosaic_0001>
module attributes {stable_mosaic.version = 11 : i64} {
  func.func @msgcs_kernel(%arg0: i32, %arg1: i32, %arg2: memref<2xf32, #tpu.memory_space<smem>>, %arg3: memref<2x4x256xf32, #tpu.memory_space<vmem>>, %arg4: memref<2x4x256xf32, #tpu.memory_space<vmem>>, %arg5: memref<1x256xf32, #tpu.memory_space<vmem>>, %arg6: memref<8x4xf32, #tpu.memory_space<vmem>>, %arg7: memref<8x4xf32, #tpu.memory_space<vmem>>, %arg8: memref<8x1xf32, #tpu.memory_space<vmem>>, %arg9: memref<8x1xf32, #tpu.memory_space<vmem>>, %arg10: memref<2x4x256xf32, #tpu.memory_space<vmem>>) attributes {dimension_semantics = [#tpu.dimension_semantics<parallel>, #tpu.dimension_semantics<parallel>], iteration_bounds = array<i64: 1, 1>, scalar_prefetch = 0 : i64, scratch_operands = 0 : i64, tpu.core_type = #tpu.core_type<tc>, window_params = [{transform_indices = @transform_0, window_bounds = array<i64: 2>}, {transform_indices = @transform_1, window_bounds = array<i64: 2, 4, 256>}, {transform_indices = @transform_2, window_bounds = array<i64: 2, 4, 256>}, {transform_indices = @transform_3, window_bounds = array<i64: 1, 256>}, {pipeline_mode = #tpu.pipeline_mode<synchronous>, transform_indices = @transform_4, window_bounds = array<i64: 8, 4>}, {pipeline_mode = #tpu.pipeline_mode<synchronous>, transform_indices = @transform_5, window_bounds = array<i64: 8, 4>}, {pipeline_mode = #tpu.pipeline_mode<synchronous>, transform_indices = @transform_6, window_bounds = array<i64: 8, 1>}, {pipeline_mode = #tpu.pipeline_mode<synchronous>, transform_indices = @transform_7, window_bounds = array<i64: 8, 1>}, {transform_indices = @transform_8, window_bounds = array<i64: 2, 4, 256>}]} {
    %c0 = arith.constant 0 : index
    %c0_0 = arith.constant 0 : index
    %0 = vector.load %arg6[%c0, %c0_0] : memref<8x4xf32, #tpu.memory_space<vmem>>, vector<8x4xf32>
    %c0_1 = arith.constant 0 : index
    %c0_2 = arith.constant 0 : index
    %1 = vector.load %arg7[%c0_1, %c0_2] : memref<8x4xf32, #tpu.memory_space<vmem>>, vector<8x4xf32>
    %c0_3 = arith.constant 0 : index
    %c0_4 = arith.constant 0 : index
    %2 = vector.load %arg8[%c0_3, %c0_4] : memref<8x1xf32, #tpu.memory_space<vmem>>, vector<8x1xf32>
    %c0_5 = arith.constant 0 : index
    %c0_6 = arith.constant 0 : index
    %3 = vector.load %arg9[%c0_5, %c0_6] : memref<8x1xf32, #tpu.memory_space<vmem>>, vector<8x1xf32>
    %c0_7 = arith.constant 0 : index
    %c0_8 = arith.constant 0 : index
    %4 = vector.load %arg5[%c0_7, %c0_8] : memref<1x256xf32, #tpu.memory_space<vmem>>, vector<1x256xf32>
    %c0_9 = arith.constant 0 : index
    %5 = memref.load %arg2[%c0_9] : memref<2xf32, #tpu.memory_space<smem>>
    %c1 = arith.constant 1 : index
    %6 = memref.load %arg2[%c1] : memref<2xf32, #tpu.memory_space<smem>>
    %c0_10 = arith.constant 0 : index
    %c0_11 = arith.constant 0 : index
    %c0_12 = arith.constant 0 : index
    %7 = vector.load %arg4[%c0_10, %c0_11, %c0_12] : memref<2x4x256xf32, #tpu.memory_space<vmem>>, vector<1x4x256xf32>
    %8 = vector.shape_cast %7 : vector<1x4x256xf32> to vector<4x256xf32>
    %c0_13 = arith.constant 0 : index
    %c0_14 = arith.constant 0 : index
    %c0_15 = arith.constant 0 : index
    %9 = vector.load %arg3[%c0_13, %c0_14, %c0_15] : memref<2x4x256xf32, #tpu.memory_space<vmem>>, vector<1x4x256xf32>
    %10 = vector.shape_cast %9 : vector<1x4x256xf32> to vector<4x256xf32>
    %cst = arith.constant dense<0.000000e+00> : vector<8x256xf32>
    %11 = tpu.matmul %0, %10, %cst {dimension_numbers = #tpu.dot_dimension_numbers<[1], [0], [0], [1], [0, 0, 1, 1], [], []>} : vector<8x4xf32>, vector<4x256xf32>, vector<8x256xf32> -> vector<8x256xf32>
    %cst_16 = arith.constant dense<0.000000e+00> : vector<8x256xf32>
    %12 = tpu.matmul %1, %8, %cst_16 {dimension_numbers = #tpu.dot_dimension_numbers<[1], [0], [0], [1], [0, 0, 1, 1], [], []>} : vector<8x4xf32>, vector<4x256xf32>, vector<8x256xf32> -> vector<8x256xf32>
    %13 = arith.addf %11, %12 : vector<8x256xf32>
    %14 = vector.broadcast %2 : vector<8x1xf32> to vector<8x256xf32>
    %15 = arith.addf %13, %14 : vector<8x256xf32>
    %cst_17 = arith.constant 0.000000e+00 : f32
    %16 = vector.broadcast %cst_17 : f32 to vector<8x256xf32>
    %17 = arith.maximumf %15, %16 : vector<8x256xf32>
    %18 = vector.broadcast %3 : vector<8x1xf32> to vector<8x256xf32>
    %19 = arith.mulf %17, %18 : vector<8x256xf32>
    %cst_18 = arith.constant dense<0.000000e+00> : vector<256xf32>
    %20 = vector.multi_reduction <add>, %19, %cst_18 [0] : vector<8x256xf32> to vector<256xf32>
    %21 = vector.shape_cast %20 : vector<256xf32> to vector<1x256xf32>
    %22 = vector.broadcast %5 : f32 to vector<1x256xf32>
    %23 = arith.addf %21, %22 : vector<1x256xf32>
    %cst_19 = arith.constant 0.000000e+00 : f32
    %24 = vector.broadcast %cst_19 : f32 to vector<1x256xf32>
    %25 = arith.maximumf %23, %24 : vector<1x256xf32>
    %26 = arith.mulf %4, %25 : vector<1x256xf32>
    %27 = vector.broadcast %6 : f32 to vector<1x256xf32>
    %28 = arith.addf %26, %27 : vector<1x256xf32>
    %29 = arith.negf %28 : vector<1x256xf32>
    %30 = math.exp %29 : vector<1x256xf32>
    %cst_20 = arith.constant 1.000000e+00 : f32
    %31 = vector.broadcast %cst_20 : f32 to vector<1x256xf32>
    %32 = arith.addf %31, %30 : vector<1x256xf32>
    %33 = arith.divf %31, %32 : vector<1x256xf32>
    %34 = vector.broadcast %33 : vector<1x256xf32> to vector<4x256xf32>
    %35 = arith.mulf %8, %34 : vector<4x256xf32>
    %c0_21 = arith.constant 0 : index
    %c0_22 = arith.constant 0 : index
    %c0_23 = arith.constant 0 : index
    %36 = vector.load %arg10[%c0_21, %c0_22, %c0_23] : memref<2x4x256xf32, #tpu.memory_space<vmem>>, vector<1x4x256xf32>
    %37 = vector.shape_cast %36 : vector<1x4x256xf32> to vector<4x256xf32>
    %38 = vector.shape_cast %35 : vector<4x256xf32> to vector<1x4x256xf32>
    tpu.vector_store %arg10[%c0_21, %c0_22, %c0_23], %38 {strides = array<i32>} : memref<2x4x256xf32, #tpu.memory_space<vmem>>, vector<1x4x256xf32>,
    %c1_24 = arith.constant 1 : index
    %c0_25 = arith.constant 0 : index
    %c0_26 = arith.constant 0 : index
    %39 = vector.load %arg4[%c1_24, %c0_25, %c0_26] : memref<2x4x256xf32, #tpu.memory_space<vmem>>, vector<1x4x256xf32>
    %40 = vector.shape_cast %39 : vector<1x4x256xf32> to vector<4x256xf32>
    %c1_27 = arith.constant 1 : index
    %c0_28 = arith.constant 0 : index
    %c0_29 = arith.constant 0 : index
    %41 = vector.load %arg3[%c1_27, %c0_28, %c0_29] : memref<2x4x256xf32, #tpu.memory_space<vmem>>, vector<1x4x256xf32>
    %42 = vector.shape_cast %41 : vector<1x4x256xf32> to vector<4x256xf32>
    %cst_30 = arith.constant dense<0.000000e+00> : vector<8x256xf32>
    %43 = tpu.matmul %0, %42, %cst_30 {dimension_numbers = #tpu.dot_dimension_numbers<[1], [0], [0], [1], [0, 0, 1, 1], [], []>} : vector<8x4xf32>, vector<4x256xf32>, vector<8x256xf32> -> vector<8x256xf32>
    %cst_31 = arith.constant dense<0.000000e+00> : vector<8x256xf32>
    %44 = tpu.matmul %1, %40, %cst_31 {dimension_numbers = #tpu.dot_dimension_numbers<[1], [0], [0], [1], [0, 0, 1, 1], [], []>} : vector<8x4xf32>, vector<4x256xf32>, vector<8x256xf32> -> vector<8x256xf32>
    %45 = arith.addf %43, %44 : vector<8x256xf32>
    %46 = vector.broadcast %2 : vector<8x1xf32> to vector<8x256xf32>
    %47 = arith.addf %45, %46 : vector<8x256xf32>
    %cst_32 = arith.constant 0.000000e+00 : f32
    %48 = vector.broadcast %cst_32 : f32 to vector<8x256xf32>
    %49 = arith.maximumf %47, %48 : vector<8x256xf32>
    %50 = vector.broadcast %3 : vector<8x1xf32> to vector<8x256xf32>
    %51 = arith.mulf %49, %50 : vector<8x256xf32>
    %cst_33 = arith.constant dense<0.000000e+00> : vector<256xf32>
    %52 = vector.multi_reduction <add>, %51, %cst_33 [0] : vector<8x256xf32> to vector<256xf32>
    %53 = vector.shape_cast %52 : vector<256xf32> to vector<1x256xf32>
    %54 = vector.broadcast %5 : f32 to vector<1x256xf32>
    %55 = arith.addf %53, %54 : vector<1x256xf32>
    %cst_34 = arith.constant 0.000000e+00 : f32
    %56 = vector.broadcast %cst_34 : f32 to vector<1x256xf32>
    %57 = arith.maximumf %55, %56 : vector<1x256xf32>
    %58 = arith.mulf %4, %57 : vector<1x256xf32>
    %59 = vector.broadcast %6 : f32 to vector<1x256xf32>
    %60 = arith.addf %58, %59 : vector<1x256xf32>
    %61 = arith.negf %60 : vector<1x256xf32>
    %62 = math.exp %61 : vector<1x256xf32>
    %cst_35 = arith.constant 1.000000e+00 : f32
    %63 = vector.broadcast %cst_35 : f32 to vector<1x256xf32>
    %64 = arith.addf %63, %62 : vector<1x256xf32>
    %65 = arith.divf %63, %64 : vector<1x256xf32>
    %66 = vector.broadcast %65 : vector<1x256xf32> to vector<4x256xf32>
    %67 = arith.mulf %40, %66 : vector<4x256xf32>
    %c1_36 = arith.constant 1 : index
    %c0_37 = arith.constant 0 : index
    %c0_38 = arith.constant 0 : index
    %68 = vector.load %arg10[%c1_36, %c0_37, %c0_38] : memref<2x4x256xf32, #tpu.memory_space<vmem>>, vector<1x4x256xf32>
    %69 = vector.shape_cast %68 : vector<1x4x256xf32> to vector<4x256xf32>
    %70 = vector.shape_cast %67 : vector<4x256xf32> to vector<1x4x256xf32>
    tpu.vector_store %arg10[%c1_36, %c0_37, %c0_38], %70 {strides = array<i32>} : memref<2x4x256xf32, #tpu.memory_space<vmem>>, vector<1x4x256xf32>,
    return
  }
  func.func @transform_0(%arg0: i32, %arg1: i32) -> i32 {
    %c0_i32 = arith.constant 0 : i32
    %c0_i32_0 = arith.constant 0 : i32
    return %c0_i32 : i32
  }
  func.func @transform_1(%arg0: i32, %arg1: i32) -> (i32, i32, i32) {
    %c0_i32 = arith.constant 0 : i32
    %c0_i32_0 = arith.constant 0 : i32
    return %arg1, %c0_i32, %arg0 : i32, i32, i32
  }
  func.func @transform_2(%arg0: i32, %arg1: i32) -> (i32, i32, i32) {
    %c0_i32 = arith.constant 0 : i32
    %c0_i32_0 = arith.constant 0 : i32
    return %arg1, %c0_i32, %arg0 : i32, i32, i32
  }
  func.func @transform_3(%arg0: i32, %arg1: i32) -> (i32, i32) {
    %c0_i32 = arith.constant 0 : i32
    %c0_i32_0 = arith.constant 0 : i32
    return %c0_i32, %arg0 : i32, i32
  }
  func.func @transform_4(%arg0: i32, %arg1: i32) -> (i32, i32) {
    %c0_i32 = arith.constant 0 : i32
    %c0_i32_0 = arith.constant 0 : i32
    %c0_i32_1 = arith.constant 0 : i32
    return %c0_i32, %c0_i32_0 : i32, i32
  }
  func.func @transform_5(%arg0: i32, %arg1: i32) -> (i32, i32) {
    %c0_i32 = arith.constant 0 : i32
    %c0_i32_0 = arith.constant 0 : i32
    %c0_i32_1 = arith.constant 0 : i32
    return %c0_i32, %c0_i32_0 : i32, i32
  }
  func.func @transform_6(%arg0: i32, %arg1: i32) -> (i32, i32) {
    %c0_i32 = arith.constant 0 : i32
    %c0_i32_0 = arith.constant 0 : i32
    %c0_i32_1 = arith.constant 0 : i32
    return %c0_i32, %c0_i32_0 : i32, i32
  }
  func.func @transform_7(%arg0: i32, %arg1: i32) -> (i32, i32) {
    %c0_i32 = arith.constant 0 : i32
    %c0_i32_0 = arith.constant 0 : i32
    %c0_i32_1 = arith.constant 0 : i32
    return %c0_i32, %c0_i32_0 : i32, i32
  }
  func.func @transform_8(%arg0: i32, %arg1: i32) -> (i32, i32, i32) {
    %c0_i32 = arith.constant 0 : i32
    %c0_i32_0 = arith.constant 0 : i32
    return %arg1, %c0_i32, %arg0 : i32, i32, i32
  }
}

</mosaic_0001>

<bundles_post_ra>
// kernel: msgcs_forward.1
= control target key start
LH: loop header
LB: loop body
LE: loop exit
PB: predicated region body
PF: predicated region fallthrough
CT: control target
= control target key end

     0   :  { %13 = vsyncpa [#allocation3], 0  ;;  %s433_s30 = smov [#allocation2]   ;;  %s547_s0 = inlined_call_operand.vmem [shape: f32[2], index: 0, kind: input, shape index: {}]   ;;  %s548_s1 = inlined_call_operand.vmem [shape: f32[2,4,256], index: 1, kind: input, shape index: {}]   ;;  %s549_s2 = inlined_call_operand.vmem [shape: f32[2,4,256], index: 2, kind: input, shape index: {}]   ;;  %s550_s3 = inlined_call_operand.vmem [shape: f32[1,256], index: 3, kind: input, shape index: {}]   ;;  %s551_s4 = inlined_call_operand.vmem [shape: f32[8,4], index: 4, kind: input, shape index: {}]   ;;  %s552_s5 = inlined_call_operand.vmem [shape: f32[8,4], index: 5, kind: input, shape index: {}]   ;;  %s553_s6 = inlined_call_operand.vmem [shape: f32[8,1], index: 6, kind: input, shape index: {}]   ;;  %s554_s7 = inlined_call_operand.vmem [shape: f32[8,1], index: 7, kind: input, shape index: {}]   ;;  %s555_s8 = inlined_call_operand.vmem [shape: f32[2,4,256], index: 8, kind: output, shape index: {}]  }
   0x1   :  { %s19_s29 = sshll.u32 %s547_s0, 4  ;;  %s20_s29 = int_to_ptr.vmem [resolvable:$true] %s19_s29 }
   0x2   :  { %22 = dma.vmem_to_smem %s20_s29, 16, %s433_s30, [#allocation3]  }
   0x3   :  { %431 = dma.done.wait [#allocation3], 16  }
   0x4   :  { %432 = vsyncadd [#allocation3], 4294967280 }
   0x5   :  { %41 = sfence }
   0x6   :  { %v486_v0 = vld [vmem:[%s549_s2] sm:$0xff]  ;;  %v434_v1 = vmov 0   ;;  %vm59_vm0 = vcmask 1043456   ;;  %vm55_vm1 = vcmask 31744   ;;  %v508_v8 = vld [vmem:[%s549_s2 + $0x8] sm:$0xff]  ;;  %s529_s2 = sld [smem:[#allocation2 + $0x1]] }
   0x7   :  { %52 = vst [vmem:[#allocation1] ss:$2 sm:$0xff] %v486_v0  ;;  %410 = vset.pattern.permute.xlu0 %v434_v1  ;;  %v44_v2 = vld [vmem:[%s553_s6] sm:$0xff]  ;;  %v397_v12 = vld [vmem:[%s548_s1 + $0x8] sm:$0xff]  ;;  %vm191_vm2 = vcmask 1040384  }
   0x8   :  { %157 = vperm.xlu0 %410, %v44_v2   ;;  %v50_v3 = vld [vmem:[%s548_s1] sm:$0xff]  ;;  %s47_s1 = sld [smem:[#allocation2]] }
   0x9   :  { %v43_v4 = vld [vmem:[%s552_s5] sm:$0xff] }
   0xa   :  { %v45_v5 = vld [vmem:[%s554_s7] sm:$0xff] }
   0xb   :  { %v42_v9 = vld [vmem:[%s551_s4] sm:$0xff] }
   0xc   :  { %v46_v60 = vld [vmem:[%s550_s3] sm:$0x3]  ;;  %v195_v1 = vstv %s529_s2 }
   0xe   :  { %v53_v6 = vld.sshfl [vmem:[#allocation1] sm:$0xff pattern:$0x75316420]  ;;  %v54_v7 = vld.sshfl [vmem:[#allocation1 + $0x8] sm:$0xff pattern:$0x75316420]  ;;  %v183_v47 = vstv %s47_s1 }
   0xf   :  { %105 = vst [vmem:[#allocation1] ss:$2 sm:$0xff] %v50_v3  ;;  %389 = vmatpush.msk.msra.mxu1 %vm59_vm0, %v54_v7  ;;  %387 = vmatpush.msk.msra.mxu0 %vm59_vm0, %v53_v6 }
  0x10   :  { %390 = vmatmul.msk.f32.vlgmr.msra.gmra.mxu1 %vm55_vm1, %v43_v4  ;;  %388 = vmatmul.msk.f32.vlgmr.msra.gmra.mxu0 %vm55_vm1, %v43_v4 }
  0x11   :  { %166 = vperm.xlu0 %410, %v45_v5  }
  0x16   :  { %v107_v10 = vld.sshfl [vmem:[#allocation1 + $0x8] sm:$0xff pattern:$0x75316420]  ;;  %v106_v11 = vld.sshfl [vmem:[#allocation1] sm:$0xff pattern:$0x75316420] }
  0x17   :  { %393 = vmatpush.msk.msra.mxu3 %vm59_vm0, %v107_v10  ;;  %391 = vmatpush.msk.msra.mxu2 %vm59_vm0, %v106_v11  ;;  %229 = vst [vmem:[#allocation1] ss:$2 sm:$0xff] %v508_v8 }
  0x18   :  { %394 = vmatmul.msk.f32.vlgmr.msra.gmra.mxu3 %vm55_vm1, %v42_v9  ;;  %392 = vmatmul.msk.f32.vlgmr.msra.gmra.mxu2 %vm55_vm1, %v42_v9 }
  0x1e   :  { %v230_v13 = vld.sshfl [vmem:[#allocation1] sm:$0xff pattern:$0x75316420]  ;;  %v231_v14 = vld.sshfl [vmem:[#allocation1 + $0x8] sm:$0xff pattern:$0x75316420] }
  0x1f   :  { %277 = vst [vmem:[#allocation1] ss:$2 sm:$0xff] %v397_v12  ;;  %398 = vmatpush.msk.msrb.mxu0 %vm59_vm0, %v230_v13  ;;  %400 = vmatpush.msk.msrb.mxu1 %vm59_vm0, %v231_v14 }
  0x20   :  { %399 = vmatmul.msk.f32.vlgmr.msrb.gmra.mxu0 %vm55_vm1, %v43_v4  ;;  %401 = vmatmul.msk.f32.vlgmr.msrb.gmra.mxu1 %vm55_vm1, %v43_v4 }
  0x26   :  { %v278_v15 = vld.sshfl [vmem:[#allocation1] sm:$0xff pattern:$0x75316420]  ;;  %v279_v16 = vld.sshfl [vmem:[#allocation1 + $0x8] sm:$0xff pattern:$0x75316420] }
  0x27   :  { %402 = vmatpush.msk.msrb.mxu2 %vm59_vm0, %v278_v15  ;;  %404 = vmatpush.msk.msrb.mxu3 %vm59_vm0, %v279_v16 }
  0x28   :  { %403 = vmatmul.msk.f32.vlgmr.msrb.gmra.mxu2 %vm55_vm1, %v42_v9  ;;  %405 = vmatmul.msk.f32.vlgmr.msrb.gmra.mxu3 %vm55_vm1, %v42_v9 }
  0x7a   :  { %v158_v17 = vpop.permute.xlu0 %157 }
  0x83   :  { %v167_v26 = vpop.permute.xlu0 %166 }
  0x8d   :  { %v101_v18 = vpop.f32.mrf.mxu1  ;;  %v81_v19 = vpop.f32.mrf.mxu0 }
  0x9b   :  { %v152_v20 = vpop.f32.mrf.mxu3  ;;  %v132_v21 = vpop.f32.mrf.mxu2 }
  0x9c   :  { %v153_v22 = vadd.f32 %v152_v20, %v101_v18  ;;  %v133_v23 = vadd.f32 %v132_v21, %v81_v19 }
  0x9d   :  { %v253_v37 = vpop.f32.mrf.mxu0  ;;  %v273_v38 = vpop.f32.mrf.mxu1 }
  0x9e   :  { %v161_v24 = vadd.f32 %v158_v17, %v153_v22  ;;  %v160_v25 = vadd.f32 %v158_v17, %v133_v23 }
  0xa0   :  { %v163_v27 = vmax.f32 %v161_v24, 0.0  ;;  %v162_v28 = vmax.f32 %v160_v25, 0.0 }
  0xa2   :  { %v169_v29 = vmul.f32 %v167_v26, %v162_v28  ;;  %v170_v30 = vmul.f32 %v167_v26, %v163_v27 }
  0xa4   :  { %v171_v31 = vrot.slane %v169_v29, 4  ;;  %v177_v32 = vrot.slane %v170_v30, 4 }
  0xa6   :  { %v172_v33 = vadd.f32 %v171_v31, %v169_v29  ;;  %v178_v34 = vadd.f32 %v177_v32, %v170_v30 }
  0xa8   :  { %v173_v35 = vrot.slane %v172_v33, 2  ;;  %v179_v36 = vrot.slane %v178_v34, 2 }
  0xaa   :  { %v174_v39 = vadd.f32 %v173_v35, %v172_v33  ;;  %v180_v40 = vadd.f32 %v179_v36, %v178_v34 }
  0xab   :  { %v301_v41 = vpop.f32.mrf.mxu2  ;;  %v321_v42 = vpop.f32.mrf.mxu3 }
  0xac   :  { %v175_v43 = vrot.slane %v174_v39, 1  ;;  %v181_v44 = vrot.slane %v180_v40, 1  ;;  %v302_v45 = vadd.f32 %v301_v41, %v253_v37  ;;  %v322_v46 = vadd.f32 %v321_v42, %v273_v38 }
  0xae   :  { %v176_v48 = vadd.f32 %v175_v43, %v174_v39  ;;  %v182_v49 = vadd.f32 %v181_v44, %v180_v40  ;;  %v324_v50 = vadd.f32 %v302_v45, %v158_v17  ;;  %v325_v51 = vadd.f32 %v322_v46, %v158_v17 }
  0xb0   :  { %v184_v52 = vadd.f32 %v183_v47, %v176_v48  ;;  %v185_v53 = vadd.f32 %v183_v47, %v182_v49  ;;  %v326_v54 = vmax.f32 %v324_v50, 0.0  ;;  %v327_v55 = vmax.f32 %v325_v51, 0.0 }
  0xb2   :  { %v186_v56 = vmax.f32 %v184_v52, 0.0  ;;  %v187_v57 = vmax.f32 %v185_v53, 0.0  ;;  %v328_v58 = vmul.f32 %v326_v54, %v167_v26  ;;  %v329_v59 = vmul.f32 %v327_v55, %v167_v26 }
  0xb4   :  { %v190_v61 = vrot.slane %v187_v57, 7  ;;  %v330_v62 = vrot.slane %v328_v58, 4  ;;  %v336_v63 = vrot.slane %v329_v59, 4 }
  0xb6   :  { %v192_v2 = vsel %vm191_vm2, %v186_v56, %v190_v61  ;;  %v331_v3 = vadd.f32 %v330_v62, %v328_v58  ;;  %v337_v4 = vadd.f32 %v336_v63, %v329_v59 }
  0xb7   :  { %v194_v5 = vmul.f32 %v192_v2, %v46_v60 }
  0xb8   :  { %v332_v6 = vrot.slane %v331_v3, 2  ;;  %v338_v7 = vrot.slane %v337_v4, 2 }
  0xb9   :  { %v196_v9 = vadd.f32 %v195_v1, %v194_v5 }
  0xba   :  { %v333_v10 = vadd.f32 %v332_v6, %v331_v3  ;;  %v339_v11 = vadd.f32 %v338_v7, %v337_v4 }
  0xbb   :  { %v395_v12 = vmul.f32 -1.442695, %v196_v9 }
  0xbc   :  { %v334_v13 = vrot.slane %v333_v10, 1  ;;  %v340_v14 = vrot.slane %v339_v11, 1 }
  0xbd   :  { %411 = vpow2.f32 %v395_v12 }
  0xbe   :  { %v335_v15 = vadd.f32 %v334_v13, %v333_v10  ;;  %v341_v16 = vadd.f32 %v340_v14, %v339_v11 }
  0xc0   :  { %v343_v17 = vadd.f32 %v341_v16, %v183_v47  ;;  %v342_v18 = vadd.f32 %v335_v15, %v183_v47 }
  0xc2   :  { %v345_v19 = vmax.f32 %v343_v17, 0.0  ;;  %v344_v23 = vmax.f32 %v342_v18, 0.0 }
  0xc3   :  { %v412_v20 = vpop.eup %411 }
  0xc4   :  { %v200_v21 = vadd.f32 1.0, %v412_v20  ;;  %v348_v22 = vrot.slane %v345_v19, 7 }
  0xc6   :  { %413 = vrcp.f32 %v200_v21  ;;  %v349_v24 = vsel %vm191_vm2, %v344_v23, %v348_v22  ;;  %v212_v31 = vand.u32 2147483648, %v200_v21  ;;  %v210_v33 = vand.u32 2147483647, %v200_v21 }
  0xc7   :  { %v351_v25 = vmul.f32 %v349_v24, %v46_v60  ;;  %vm206_vm4 = vweird.f32 %v200_v21 }
  0xc8   :  { %v213_v36 = vor.u32 1.1754944e-38, %v212_v31  ;;  %vm211_vm6 = vcmp.eq.f32.partialorder %v210_v33, 8.507059e+37 }
  0xc9   :  { %v352_v26 = vadd.f32 %v351_v25, %v195_v1 }
  0xcb   :  { %v406_v28 = vmul.f32 -1.442695, %v352_v26 }
  0xcc   :  { %v414_v27 = vpop.eup %413 }
  0xcd   :  { %v202_v29 = vmul.f32 %v414_v27, %v200_v21  ;;  %415 = vpow2.f32 %v406_v28  ;;  %vm207_vm3 = vweird.f32 %v414_v27 }
  0xce   :  { %vm208_vm5 = vmor %vm206_vm4, %vm207_vm3 }
  0xcf   :  { %v203_v30 = vsub.f32 1.0, %v202_v29 }
  0xd1   :  { %v204_v32 = vmul.f32 %v414_v27, %v203_v30 }
  0xd3   :  { %v205_v34 = vadd.f32 %v414_v27, %v204_v32  ;;  %v416_v35 = vpop.eup %415 }
  0xd4   :  { %v356_v38 = vadd.f32 1.0, %v416_v35 }
  0xd5   :  { %v209_v37 = vsel %vm208_vm5, %v414_v27, %v205_v34 }
  0xd6   :  { %v214_v39 = vsel %vm211_vm6, %v213_v36, %v209_v37  ;;  %417 = vrcp.f32 %v356_v38  ;;  %v368_v48 = vand.u32 2147483648, %v356_v38  ;;  %v366_v50 = vand.u32 2147483647, %v356_v38 }
  0xd7   :  { %v218_v40 = vperm.slane %v214_v39, 1  ;;  %v217_v41 = vperm.slane %v214_v39, 0  ;;  %vm362_vm8 = vweird.f32 %v356_v38 }
  0xd8   :  { %v369_v52 = vor.u32 1.1754944e-38, %v368_v48  ;;  %vm367_vm10 = vcmp.eq.f32.partialorder %v366_v50, 8.507059e+37 }
  0xd9   :  { %v219_v42 = vrot.slane %v218_v40, 4 }
  0xdb   :  { %v220_v43 = vsel %vm59_vm0, %v217_v41, %v219_v42 }
  0xdc   :  { %v222_v44 = vmul.f32 %v220_v43, %v486_v0  ;;  %v418_v45 = vpop.eup %417 }
  0xdd   :  { %v358_v46 = vmul.f32 %v418_v45, %v356_v38  ;;  %vm363_vm7 = vweird.f32 %v418_v45 }
  0xde   :  { %223 = vst [vmem:[%s555_s8] sm:$0xff] %v222_v44  ;;  %vm364_vm9 = vmor %vm362_vm8, %vm363_vm7 }
  0xdf   :  { %v359_v47 = vsub.f32 1.0, %v358_v46 }
  0xe1   :  { %v360_v49 = vmul.f32 %v418_v45, %v359_v47 }
  0xe3   :  { %v361_v51 = vadd.f32 %v418_v45, %v360_v49 }
  0xe5   :  { %v365_v53 = vsel %vm364_vm9, %v418_v45, %v361_v51 }
  0xe6   :  { %v370_v54 = vsel %vm367_vm10, %v369_v52, %v365_v53 }
  0xe7   :  { %v374_v55 = vperm.slane %v370_v54, 1  ;;  %v373_v0 = vperm.slane %v370_v54, 0 }
  0xe9   :  { %v375_v56 = vrot.slane %v374_v55, 4 }
  0xeb   :  { %v376_v57 = vsel %vm59_vm0, %v373_v0, %v375_v56 }
  0xec   :  { %v378_v58 = vmul.f32 %v508_v8, %v376_v57 }
  0xee   :  { %407 = vst [vmem:[%s555_s8 + $0x8] sm:$0xff] %v378_v58 }
  0xef   :  { %385 = vsyncpa [#allocation3], 1 }

</bundles_post_ra>
